<compile_context>
chip_gen: v5e
topology: v5e:2x2
jax: 0.10.0
libtpu: 0.0.40
codegen_flags: <defaults>
</compile_context>

<pallas_src>
import math

import jax
import jax.numpy as jnp
from jax.experimental import pallas as pl
from jax.experimental.pallas import tpu as pltpu


def dyt_kernel(alpha_ref, w_ref, b_ref, x_ref, o_ref):
    # alpha_ref: (1,) f32 in SMEM.  w_ref/b_ref: (1, TL) in the compute dtype.
    # x_ref/o_ref: (tile_rows, TL) in the I/O dtype.
    cdt = w_ref.dtype
    # Splat alpha into a (1,1) vector in f32 and convert once to the compute
    # dtype (avoids relying on sub-32-bit scalar-core arithmetic).
    alpha = jnp.full((1, 1), alpha_ref[0], jnp.float32).astype(cdt)
    x = x_ref[...].astype(cdt)              # no-op for f32 and bf16/f16 inputs
    y = jnp.tanh(x * alpha)                 # EUP; bf16 path on v6e/v7x for half inputs
    o_ref[...] = (y * w_ref[...] + b_ref[...]).astype(o_ref.dtype)


def _cdiv(a, b):
    return -(-a // b)


def _lcm(a, b):
    return a * b // math.gcd(a, b)


def dyt_forward(x, alpha, weight, bias, *, target_block_bytes=4 * 1024 * 1024):
    """x: (..., F). alpha: (1,). weight/bias: (F,). Returns array shaped like x."""
    orig_shape = x.shape
    dtype = x.dtype
    F = weight.shape[0]
    assert orig_shape[-1] == F, "last dim of x must equal num_features"

    N = x.size
    itemsize = jnp.dtype(dtype).itemsize
    # Sublane multiple for the row tile (f32: 8, bf16/f16: 16, 8-bit: 32).
    sub = {4: 8, 2: 16, 1: 32}.get(itemsize, 8)

    # Compute dtype: keep half-precision inputs in their own dtype (native
    # VPU/EUP path on v6e/v7x); everything else computes in f32.
    if jnp.dtype(dtype) in (jnp.dtype(jnp.bfloat16), jnp.dtype(jnp.float16)):
        compute_dtype = dtype
    else:
        compute_dtype = jnp.float32
    cd_size = jnp.dtype(compute_dtype).itemsize

    # ---- choose the 2-D slab (rows, width): always a zero-copy reshape ----
    L = _lcm(F, 128)
    if N % L == 0:
        width = L        # lane-folded: width % 128 == 0 -> unmasked dense stores
    else:
        width = F        # direct: block last dim == full array dim (always legal);
                         # possibly masked stores, but never pads or copies x.
    rows_total = N // width
    x2 = x.reshape(rows_total, width)

    # ---- lane tile: full rows unless a minimal block would blow the budget ----
    if width % 128 == 0 and sub * width * itemsize > target_block_bytes:
        # Extremely wide folded rows: split lanes on a 128-multiple divisor.
        cap = max(128, (target_block_bytes // (sub * itemsize)) // 128 * 128)
        TL = 128
        d = min(cap, width)
        while d > 128:
            if width % d == 0:
                TL = d
                break
            d -= 128
    else:
        TL = width       # full rows: fully contiguous HBM reads/writes
    lane_tiles = width // TL

    # ---- row tile: VMEM budget, but keep >= 2 row steps when there is work ----
    if rows_total <= sub:
        tile_rows = rows_total                      # full extent (always legal)
    else:
        budget_rows = max(sub, (target_block_bytes // (TL * itemsize)) // sub * sub)
        tile_rows = budget_rows
        if rows_total >= 2 * sub:
            # Cap at ~half the rows so the parallel row axis has >= 2 grid steps
            # (lets both v7x TensorCores stream; negligible cost on v5e/v6e).
            half = _cdiv(_cdiv(rows_total, 2), sub) * sub
            tile_rows = min(tile_rows, half)
        if tile_rows >= rows_total:
            tile_rows = rows_total
    row_tiles = _cdiv(rows_total, tile_rows)

    # ---- parameters (tiled to the lane width, in the compute dtype) ----
    reps = width // F
    w_row = jnp.tile(weight.astype(compute_dtype), reps).reshape(1, width)
    b_row = jnp.tile(bias.astype(compute_dtype), reps).reshape(1, width)
    alpha_s = alpha.reshape(1).astype(jnp.float32)

    # ---- grid & specs (lane axis outermost so w/b blocks stay VMEM-resident) ----
    if lane_tiles == 1:
        grid = (row_tiles,)
        in_specs = [
            pl.BlockSpec(memory_space=pltpu.SMEM),               # alpha scalar
            pl.BlockSpec((1, TL), lambda i: (0, 0)),             # weight (fetched once)
            pl.BlockSpec((1, TL), lambda i: (0, 0)),             # bias   (fetched once)
            pl.BlockSpec((tile_rows, TL), lambda i: (i, 0)),     # x tile
        ]
        out_specs = pl.BlockSpec((tile_rows, TL), lambda i: (i, 0))
        dim_sem = ("parallel",)
    else:
        grid = (lane_tiles, row_tiles)
        in_specs = [
            pl.BlockSpec(memory_space=pltpu.SMEM),
            pl.BlockSpec((1, TL), lambda j, i: (0, j)),          # constant over inner axis
            pl.BlockSpec((1, TL), lambda j, i: (0, j)),
            pl.BlockSpec((tile_rows, TL), lambda j, i: (i, j)),
        ]
        out_specs = pl.BlockSpec((tile_rows, TL), lambda j, i: (i, j))
        dim_sem = ("parallel", "parallel")

    # Right-sized VMEM: x + out double-buffered, plus the tiny w/b rows + slack.
    block_bytes = tile_rows * TL * itemsize
    vmem_need = 4 * block_bytes + 4 * TL * cd_size + (4 << 20)
    vmem_limit = int(min(max(vmem_need, 16 << 20), 40 << 20))

    out = pl.pallas_call(
        dyt_kernel,
        out_shape=jax.ShapeDtypeStruct((rows_total, width), dtype),
        grid=grid,
        in_specs=in_specs,
        out_specs=out_specs,
        compiler_params=pltpu.CompilerParams(
            dimension_semantics=dim_sem,
            vmem_limit_bytes=vmem_limit,
        ),
        cost_estimate=pl.CostEstimate(
            flops=3 * N,
            transcendentals=N,
            bytes_accessed=2 * N * itemsize + 2 * width * cd_size,
        ),
    )(alpha_s, w_row, b_row, x2)

    return out.reshape(orig_shape)   # zero-copy: rows_total * width == N


if __name__ == "__main__":
    # Shapes implied by the module: elementwise over x with per-feature affine.
    batch, seq, num_features = 2, 8, 32
    alpha_init_value = 0.5

    key = jax.random.PRNGKey(0)
    kx, kw, kb, kx2 = jax.random.split(key, 4)
    x = jax.random.normal(kx, (batch, seq, num_features), dtype=jnp.float32)

    # Parameter init matching nn.Parameter defaults in DyT.__init__.
    alpha = jnp.ones((1,), dtype=jnp.float32) * alpha_init_value
    weight = jnp.ones((num_features,), dtype=jnp.float32)
    bias = jnp.zeros((num_features,), dtype=jnp.float32)

    out = jax.block_until_ready(dyt_forward(x, alpha, weight, bias))
    ref = jnp.tanh(alpha[0] * x) * weight + bias
    assert out.shape == x.shape and out.dtype == x.dtype
    assert jnp.allclose(out, ref, atol=1e-5, rtol=1e-5)

    # Non-trivial affine params -> validates the lane-folded weight/bias alignment.
    weight2 = jax.random.normal(kw, (num_features,), dtype=jnp.float32)
    bias2 = jax.random.normal(kb, (num_features,), dtype=jnp.float32)
    out2 = jax.block_until_ready(dyt_forward(x, alpha, weight2, bias2))
    ref2 = jnp.tanh(alpha[0] * x) * weight2 + bias2
    assert jnp.allclose(out2, ref2, atol=1e-5, rtol=1e-5)

    # bf16 input on an awkward shape (numel not a multiple of lcm(F,128)):
    # exercises the zero-copy direct path (masked stores) and the bf16 compute path.
    F3 = 96
    x3 = jax.random.normal(kx2, (2, 7, F3), dtype=jnp.bfloat16)
    w3 = jnp.ones((F3,), dtype=jnp.float32)
    b3 = jnp.zeros((F3,), dtype=jnp.float32)
    out3 = jax.block_until_ready(dyt_forward(x3, alpha, w3, b3))
    ref3 = jnp.tanh(alpha[0] * x3.astype(jnp.float32)) * w3 + b3
    assert out3.shape == x3.shape and out3.dtype == x3.dtype
    assert jnp.allclose(out3.astype(jnp.float32), ref3, atol=3e-2, rtol=3e-2)

    print("KERNEL_OK")
</pallas_src>

<mosaic_0001>
module attributes {stable_mosaic.version = 11 : i64} {
  func.func @dyt_kernel(%arg0: i32, %arg1: memref<1xf32, #tpu.memory_space<smem>>, %arg2: memref<1x128xf32, #tpu.memory_space<vmem>>, %arg3: memref<1x128xf32, #tpu.memory_space<vmem>>, %arg4: memref<4x128xf32, #tpu.memory_space<vmem>>, %arg5: memref<4x128xf32, #tpu.memory_space<vmem>>) attributes {dimension_semantics = [#tpu.dimension_semantics<parallel>], iteration_bounds = array<i64: 1>, scalar_prefetch = 0 : i64, scratch_operands = 0 : i64, tpu.core_type = #tpu.core_type<tc>, window_params = [{transform_indices = @transform_0, window_bounds = array<i64: 1>}, {pipeline_mode = #tpu.pipeline_mode<synchronous>, transform_indices = @transform_1, window_bounds = array<i64: 1, 128>}, {pipeline_mode = #tpu.pipeline_mode<synchronous>, transform_indices = @transform_2, window_bounds = array<i64: 1, 128>}, {transform_indices = @transform_3, window_bounds = array<i64: 4, 128>}, {transform_indices = @transform_4, window_bounds = array<i64: 4, 128>}]} {
    %c0 = arith.constant 0 : index
    %0 = memref.load %arg1[%c0] : memref<1xf32, #tpu.memory_space<smem>>
    %1 = vector.broadcast %0 : f32 to vector<1x1xf32>
    %c0_0 = arith.constant 0 : index
    %c0_1 = arith.constant 0 : index
    %2 = vector.load %arg4[%c0_0, %c0_1] : memref<4x128xf32, #tpu.memory_space<vmem>>, vector<4x128xf32>
    %3 = vector.broadcast %1 : vector<1x1xf32> to vector<4x128xf32>
    %4 = arith.mulf %2, %3 : vector<4x128xf32>
    %5 = math.tanh %4 : vector<4x128xf32>
    %c0_2 = arith.constant 0 : index
    %c0_3 = arith.constant 0 : index
    %6 = vector.load %arg2[%c0_2, %c0_3] : memref<1x128xf32, #tpu.memory_space<vmem>>, vector<1x128xf32>
    %7 = vector.broadcast %6 : vector<1x128xf32> to vector<4x128xf32>
    %8 = arith.mulf %5, %7 : vector<4x128xf32>
    %c0_4 = arith.constant 0 : index
    %c0_5 = arith.constant 0 : index
    %9 = vector.load %arg3[%c0_4, %c0_5] : memref<1x128xf32, #tpu.memory_space<vmem>>, vector<1x128xf32>
    %10 = vector.broadcast %9 : vector<1x128xf32> to vector<4x128xf32>
    %11 = arith.addf %8, %10 : vector<4x128xf32>
    %c0_6 = arith.constant 0 : index
    %c0_7 = arith.constant 0 : index
    %12 = vector.load %arg5[%c0_6, %c0_7] : memref<4x128xf32, #tpu.memory_space<vmem>>, vector<4x128xf32>
    tpu.vector_store %arg5[%c0_6, %c0_7], %11 {strides = array<i32>} : memref<4x128xf32, #tpu.memory_space<vmem>>, vector<4x128xf32>,
    return
  }
  func.func @transform_0(%arg0: i32) -> i32 {
    %c0_i32 = arith.constant 0 : i32
    %c0_i32_0 = arith.constant 0 : i32
    return %c0_i32 : i32
  }
  func.func @transform_1(%arg0: i32) -> (i32, i32) {
    %c0_i32 = arith.constant 0 : i32
    %c0_i32_0 = arith.constant 0 : i32
    %c0_i32_1 = arith.constant 0 : i32
    return %c0_i32, %c0_i32_0 : i32, i32
  }
  func.func @transform_2(%arg0: i32) -> (i32, i32) {
    %c0_i32 = arith.constant 0 : i32
    %c0_i32_0 = arith.constant 0 : i32
    %c0_i32_1 = arith.constant 0 : i32
    return %c0_i32, %c0_i32_0 : i32, i32
  }
  func.func @transform_3(%arg0: i32) -> (i32, i32) {
    %c0_i32 = arith.constant 0 : i32
    %c0_i32_0 = arith.constant 0 : i32
    return %arg0, %c0_i32 : i32, i32
  }
  func.func @transform_4(%arg0: i32) -> (i32, i32) {
    %c0_i32 = arith.constant 0 : i32
    %c0_i32_0 = arith.constant 0 : i32
    return %arg0, %c0_i32 : i32, i32
  }
}

</mosaic_0001>

<bundles_post_ra>
// kernel: tpu_custom_call.1
= control target key start
LH: loop header
LB: loop body
LE: loop exit
PB: predicated region body
PF: predicated region fallthrough
CT: control target
= control target key end

     0   :  { %10 = vsyncpa [#allocation4], 0  ;;  %s166_s0 = inlined_call_operand.<no memory space> [shape: f32[1], index: 0, kind: input, shape index: {}]   ;;  %s167_s1 = inlined_call_operand.vmem [shape: f32[1,128], index: 1, kind: input, shape index: {}]   ;;  %s168_s2 = inlined_call_operand.vmem [shape: f32[1,128], index: 2, kind: input, shape index: {}]   ;;  %s169_s3 = inlined_call_operand.hbm [shape: f32[4,128], index: 3, kind: input, shape index: {}]   ;;  %s170_s4 = inlined_call_operand.hbm [shape: f32[4,128], index: 4, kind: output, shape index: {}]  }
   0x1   :  { %11 = vsyncpa [#allocation5], 0  ;;  %s23_s17 = sshll.u32 %s169_s3, 4  ;;  %s124_s18 = smov [#allocation3]   ;;  %s24_s17 = int_to_ptr.hbm [resolvable:$true] %s23_s17 }
   0x2   :  { %s25_s19 = sshll.u32 %s124_s18, 4  ;;  %s26_s19 = int_to_ptr.vmem [resolvable:$true] %s25_s19 }
   0x3   :  { %28 = dma.hbm_to_vmem [thread:$0]  %s24_s17, 64, %s26_s19, [#allocation4]  }
   0x4   :  { %120 = dma.done.wait [#allocation4], 64  }
   0x5   :  { %121 = vsyncadd [#allocation4], 4294967232  ;;  %v35_v0 = vstv %s166_s0  ;;  %v34_v1 = vld [vmem:[#allocation3] sm:$0xf]  ;;  %s125_s25 = smov [#allocation6]   ;;  %s56_s29 = sshll.u32 %s170_s4, 4  ;;  %s57_s29 = int_to_ptr.hbm [resolvable:$true] %s56_s29 }
   0x6   :  { %v36_v2 = vmul.f32 %v35_v0, %v34_v1  ;;  %v68_v3 = vld [vmem:[%s167_s1] ss:$0 sm:$0xff]  ;;  %s54_s26 = sshll.u32 %s125_s25, 4  ;;  %s55_s26 = int_to_ptr.vmem [resolvable:$true] %s54_s26 }
   0x7   :  { %v69_v4 = vld [vmem:[%s168_s2] ss:$0 sm:$0xff] }
   0x8   :  { %70 = vtanh.f32 %v36_v2 }
   0xe   :  { %v71_v5 = vpop.eup %70 }
   0xf   :  { %v42_v6 = vmul.f32 %v71_v5, %v68_v3 }
  0x11   :  { %v47_v7 = vadd.f32 %v69_v4, %v42_v6 }
  0x13   :  { %48 = vst [vmem:[#allocation6] sm:$0xf] %v47_v7 }
  0x14   :  { %59 = dma.vmem_to_hbm [thread:$0]  %s55_s26, 64, %s57_s29, [#allocation5]  }
  0x15   :  { %122 = dma.done.wait [#allocation5], 64  }
  0x16   :  { %123 = vsyncadd [#allocation5], 4294967232 }
  0x17   :  { %64 = vsyncpa [#allocation4], 1 }
  0x18   :  { %65 = vsyncpa [#allocation5], 1 }

</bundles_post_ra>
